<compile_context>
chip_gen: v7x
topology: tpu7x:2x2x1
jax: 0.10.0
libtpu: 0.0.40
codegen_flags: <defaults>
</compile_context>

<pallas_src>
import functools

import jax
import jax.numpy as jnp
from jax.experimental import pallas as pl
from jax.experimental.pallas import tpu as pltpu

LANE = 128  # TPU lane width


def _round_up(x: int, m: int) -> int:
    return ((x + m - 1) // m) * m


def _persona_evolution_kernel(
    persona_ref, perf_ref,
    w1a_ref, w1b_ref, b1_ref,   # fusion_layer[0]: Linear(persona+perf -> hidden), W1 row-split
    w2_ref, b2_ref,             # fusion_layer[3]: Linear(hidden -> hidden)
    w3_ref, b3_ref,             # evolution_predictor[0]: Linear(hidden -> hidden//2)
    w4_ref, b4_ref,             # evolution_predictor[2]: Linear(hidden//2 -> persona)
    out_ref,
):
    bf16 = jnp.bfloat16

    # First Linear as two bf16 dots (no in-kernel concat / lane relayout), f32 accum.
    h1 = (jnp.dot(persona_ref[...].astype(bf16), w1a_ref[...],
                  preferred_element_type=jnp.float32)
          + jnp.dot(perf_ref[...].astype(bf16), w1b_ref[...],
                    preferred_element_type=jnp.float32)
          + b1_ref[...])
    h1 = jnp.maximum(h1, 0.0)              # ReLU in f32
    # Dropout(p=0.3) is identity in eval mode.

    h2 = jnp.dot(h1.astype(bf16), w2_ref[...],
                 preferred_element_type=jnp.float32) + b2_ref[...]
    h2 = jnp.maximum(h2, 0.0)

    h3 = jnp.dot(h2.astype(bf16), w3_ref[...],
                 preferred_element_type=jnp.float32) + b3_ref[...]
    h3 = jnp.maximum(h3, 0.0)

    h4 = jnp.dot(h3.astype(bf16), w4_ref[...],
                 preferred_element_type=jnp.float32) + b4_ref[...]

    # Slice padded lanes off BEFORE tanh and store the narrow (tile, persona_dim)
    # output directly -> no padded writeback, no wrapper slice pass.
    out_dim = out_ref.shape[1]
    out_ref[...] = jnp.tanh(h4[:, :out_dim]).astype(out_ref.dtype)


def init_params(key, persona_dim, performance_dim, hidden_dim=96):
    """Unpadded f32 params matching nn.Linear default init (uniform +-1/sqrt(fan_in)).
    Weights stored as [in, out] (transposed vs. PyTorch); biases as [1, out]."""
    def linear(k, fan_in, fan_out):
        kw, kb = jax.random.split(k)
        bound = 1.0 / jnp.sqrt(jnp.float32(fan_in))
        w = jax.random.uniform(kw, (fan_in, fan_out), jnp.float32, -bound, bound)
        b = jax.random.uniform(kb, (1, fan_out), jnp.float32, -bound, bound)
        return w, b

    k1, k2, k3, k4 = jax.random.split(key, 4)
    in_dim = persona_dim + performance_dim
    w1, b1 = linear(k1, in_dim, hidden_dim)
    w2, b2 = linear(k2, hidden_dim, hidden_dim)
    w3, b3 = linear(k3, hidden_dim, hidden_dim // 2)
    w4, b4 = linear(k4, hidden_dim // 2, persona_dim)
    return {"w1": w1, "b1": b1, "w2": w2, "b2": b2,
            "w3": w3, "b3": b3, "w4": w4, "b4": b4}


def pack_params_for_kernel(params, persona_dim):
    """One-time packing: split W1 by input source, zero-pad every output (lane)
    dim to a multiple of 128 so all in-kernel weight tiles are lane-dense, and
    store weights in bf16 (biases stay f32 and are added after f32 accumulation).
    Padded rows/cols are exactly 0, so they never leak into real outputs."""
    hidden = params["w1"].shape[1]
    half = params["w3"].shape[1]
    Hp = _round_up(hidden, LANE)
    H2p = _round_up(half, LANE)
    Op = _round_up(persona_dim, LANE)

    def pad_to(a, rows, cols, dtype):
        a = jnp.pad(a, ((0, rows - a.shape[0]), (0, cols - a.shape[1])))
        return a.astype(dtype)

    w1 = params["w1"]
    packed = {
        "w1a": pad_to(w1[:persona_dim], persona_dim, Hp, jnp.bfloat16),
        "w1b": pad_to(w1[persona_dim:], w1.shape[0] - persona_dim, Hp, jnp.bfloat16),
        "b1": pad_to(params["b1"], 1, Hp, jnp.float32),
        "w2": pad_to(params["w2"], Hp, Hp, jnp.bfloat16),
        "b2": pad_to(params["b2"], 1, Hp, jnp.float32),
        "w3": pad_to(params["w3"], Hp, H2p, jnp.bfloat16),
        "b3": pad_to(params["b3"], 1, H2p, jnp.float32),
        "w4": pad_to(params["w4"], H2p, Op, jnp.bfloat16),
        "b4": pad_to(params["b4"], 1, Op, jnp.float32),
    }
    dims = {"hidden": hidden, "half": half, "Hp": Hp, "H2p": H2p, "Op": Op}
    return packed, dims


@functools.partial(jax.jit, static_argnames=("tile_b",))
def persona_evolution_forward(persona_features, performance_features, packed, *, tile_b=2048):
    """Fused forward: batch grid ("parallel"), VMEM-resident weights, bf16 MXU
    dots with f32 accumulation, unpadded (B, persona_dim) output."""
    B, persona_dim = persona_features.shape
    _, perf_dim = performance_features.shape
    Hp = packed["w1a"].shape[1]
    H2p = packed["w3"].shape[1]
    Op = packed["w4"].shape[1]

    # Cap tile so the batch axis has >=2 grid steps when B is non-trivial
    # (lets v7x shard the "parallel" axis across its 2 TensorCores); tiny B
    # collapses to a single full-batch step.
    tile = min(tile_b, max(8, _round_up(pl.cdiv(B, 2), 8)))
    if tile >= B:
        tile = B
    grid = (pl.cdiv(B, tile),)

    def act_spec(width):
        return pl.BlockSpec((tile, width), lambda i: (i, 0))

    def const_spec(shape):
        # Whole array as a single block; constant index_map keeps it VMEM-resident.
        return pl.BlockSpec(shape, lambda i: (0, 0))

    in_specs = [
        act_spec(persona_dim),                     # persona
        act_spec(perf_dim),                        # performance
        const_spec(packed["w1a"].shape), const_spec(packed["w1b"].shape),
        const_spec(packed["b1"].shape),
        const_spec(packed["w2"].shape), const_spec(packed["b2"].shape),
        const_spec(packed["w3"].shape), const_spec(packed["b3"].shape),
        const_spec(packed["w4"].shape), const_spec(packed["b4"].shape),
    ]
    out_specs = pl.BlockSpec((tile, persona_dim), lambda i: (i, 0))

    # Advisory cost hint (what actually runs: padded MXU dims, tanh on real lanes).
    flops = 2 * B * (persona_dim * Hp + perf_dim * Hp + Hp * Hp + Hp * H2p + H2p * Op)
    weight_bytes = sum(int(v.size) * int(v.dtype.itemsize) for v in packed.values())
    bytes_accessed = B * (persona_dim + perf_dim + persona_dim) * 4 + weight_bytes
    cost = pl.CostEstimate(flops=int(flops),
                           transcendentals=int(B * persona_dim),
                           bytes_accessed=int(bytes_accessed))

    out = pl.pallas_call(
        _persona_evolution_kernel,
        out_shape=jax.ShapeDtypeStruct((B, persona_dim), jnp.float32),
        grid=grid,
        in_specs=in_specs,
        out_specs=out_specs,
        compiler_params=pltpu.CompilerParams(dimension_semantics=("parallel",)),
        cost_estimate=cost,
    )(
        persona_features, performance_features,
        packed["w1a"], packed["w1b"], packed["b1"],
        packed["w2"], packed["b2"],
        packed["w3"], packed["b3"],
        packed["w4"], packed["b4"],
    )
    return out


def reference_forward(persona_features, performance_features, params):
    """Pure-JAX f32 reference (unpadded params) for correctness checking."""
    x = jnp.concatenate([persona_features, performance_features], axis=1)
    h = jnp.maximum(x @ params["w1"] + params["b1"], 0.0)
    h = jnp.maximum(h @ params["w2"] + params["b2"], 0.0)
    h = jnp.maximum(h @ params["w3"] + params["b3"], 0.0)
    return jnp.tanh(h @ params["w4"] + params["b4"])


if __name__ == "__main__":
    batch = 8
    persona_dim = 12
    performance_dim = 6
    hidden_dim = 96

    key = jax.random.PRNGKey(0)
    k_params, k_pf, k_perf = jax.random.split(key, 3)

    params = init_params(k_params, persona_dim, performance_dim, hidden_dim)
    packed, _dims = pack_params_for_kernel(params, persona_dim)

    persona_features = jax.random.normal(k_pf, (batch, persona_dim), jnp.float32)
    performance_features = jax.random.normal(k_perf, (batch, performance_dim), jnp.float32)

    out = persona_evolution_forward(persona_features, performance_features, packed)
    out = jax.block_until_ready(out)

    ref = reference_forward(persona_features, performance_features, params)
    assert out.shape == (batch, persona_dim)
    # bf16 weights/activations on the MXU -> looser tolerance vs the f32 reference.
    assert jnp.allclose(out, ref, atol=3e-2, rtol=0.0), "mismatch vs reference"

    print("KERNEL_OK")
</pallas_src>

<mosaic_0001>
module attributes {stable_mosaic.version = 11 : i64} {
  func.func @_persona_evolution_kernel(%arg0: i32, %arg1: memref<8x12xf32, #tpu.memory_space<vmem>>, %arg2: memref<8x6xf32, #tpu.memory_space<vmem>>, %arg3: memref<12x128xbf16, #tpu.memory_space<vmem>>, %arg4: memref<6x128xbf16, #tpu.memory_space<vmem>>, %arg5: memref<1x128xf32, #tpu.memory_space<vmem>>, %arg6: memref<128x128xbf16, #tpu.memory_space<vmem>>, %arg7: memref<1x128xf32, #tpu.memory_space<vmem>>, %arg8: memref<128x128xbf16, #tpu.memory_space<vmem>>, %arg9: memref<1x128xf32, #tpu.memory_space<vmem>>, %arg10: memref<128x128xbf16, #tpu.memory_space<vmem>>, %arg11: memref<1x128xf32, #tpu.memory_space<vmem>>, %arg12: memref<8x12xf32, #tpu.memory_space<vmem>>) attributes {dimension_semantics = [#tpu.dimension_semantics<parallel>], iteration_bounds = array<i64: 1>, scalar_prefetch = 0 : i64, scratch_operands = 0 : i64, tpu.core_type = #tpu.core_type<tc>, window_params = [{transform_indices = @transform_0, window_bounds = array<i64: 8, 12>}, {transform_indices = @transform_1, window_bounds = array<i64: 8, 6>}, {pipeline_mode = #tpu.pipeline_mode<synchronous>, transform_indices = @transform_2, window_bounds = array<i64: 12, 128>}, {pipeline_mode = #tpu.pipeline_mode<synchronous>, transform_indices = @transform_3, window_bounds = array<i64: 6, 128>}, {pipeline_mode = #tpu.pipeline_mode<synchronous>, transform_indices = @transform_4, window_bounds = array<i64: 1, 128>}, {pipeline_mode = #tpu.pipeline_mode<synchronous>, transform_indices = @transform_5, window_bounds = array<i64: 128, 128>}, {pipeline_mode = #tpu.pipeline_mode<synchronous>, transform_indices = @transform_6, window_bounds = array<i64: 1, 128>}, {pipeline_mode = #tpu.pipeline_mode<synchronous>, transform_indices = @transform_7, window_bounds = array<i64: 128, 128>}, {pipeline_mode = #tpu.pipeline_mode<synchronous>, transform_indices = @transform_8, window_bounds = array<i64: 1, 128>}, {pipeline_mode = #tpu.pipeline_mode<synchronous>, transform_indices = @transform_9, window_bounds = array<i64: 128, 128>}, {pipeline_mode = #tpu.pipeline_mode<synchronous>, transform_indices = @transform_10, window_bounds = array<i64: 1, 128>}, {transform_indices = @transform_11, window_bounds = array<i64: 8, 12>}]} {
    %c0 = arith.constant 0 : index
    %c0_0 = arith.constant 0 : index
    %0 = vector.load %arg1[%c0, %c0_0] : memref<8x12xf32, #tpu.memory_space<vmem>>, vector<8x12xf32>
    %1 = arith.truncf %0 : vector<8x12xf32> to vector<8x12xbf16>
    %c0_1 = arith.constant 0 : index
    %c0_2 = arith.constant 0 : index
    %2 = vector.load %arg3[%c0_1, %c0_2] : memref<12x128xbf16, #tpu.memory_space<vmem>>, vector<12x128xbf16>
    %cst = arith.constant dense<0.000000e+00> : vector<8x128xf32>
    %3 = tpu.matmul %1, %2, %cst {dimension_numbers = #tpu.dot_dimension_numbers<[1], [0], [0], [1], [0, 0, 1, 1], [], []>} : vector<8x12xbf16>, vector<12x128xbf16>, vector<8x128xf32> -> vector<8x128xf32>
    %c0_3 = arith.constant 0 : index
    %c0_4 = arith.constant 0 : index
    %4 = vector.load %arg2[%c0_3, %c0_4] : memref<8x6xf32, #tpu.memory_space<vmem>>, vector<8x6xf32>
    %5 = arith.truncf %4 : vector<8x6xf32> to vector<8x6xbf16>
    %c0_5 = arith.constant 0 : index
    %c0_6 = arith.constant 0 : index
    %6 = vector.load %arg4[%c0_5, %c0_6] : memref<6x128xbf16, #tpu.memory_space<vmem>>, vector<6x128xbf16>
    %cst_7 = arith.constant dense<0.000000e+00> : vector<8x128xf32>
    %7 = tpu.matmul %5, %6, %cst_7 {dimension_numbers = #tpu.dot_dimension_numbers<[1], [0], [0], [1], [0, 0, 1, 1], [], []>} : vector<8x6xbf16>, vector<6x128xbf16>, vector<8x128xf32> -> vector<8x128xf32>
    %8 = arith.addf %3, %7 : vector<8x128xf32>
    %c0_8 = arith.constant 0 : index
    %c0_9 = arith.constant 0 : index
    %9 = vector.load %arg5[%c0_8, %c0_9] : memref<1x128xf32, #tpu.memory_space<vmem>>, vector<1x128xf32>
    %10 = vector.broadcast %9 : vector<1x128xf32> to vector<8x128xf32>
    %11 = arith.addf %8, %10 : vector<8x128xf32>
    %cst_10 = arith.constant 0.000000e+00 : f32
    %12 = vector.broadcast %cst_10 : f32 to vector<8x128xf32>
    %13 = arith.maximumf %11, %12 : vector<8x128xf32>
    %14 = arith.truncf %13 : vector<8x128xf32> to vector<8x128xbf16>
    %c0_11 = arith.constant 0 : index
    %c0_12 = arith.constant 0 : index
    %15 = vector.load %arg6[%c0_11, %c0_12] : memref<128x128xbf16, #tpu.memory_space<vmem>>, vector<128x128xbf16>
    %cst_13 = arith.constant dense<0.000000e+00> : vector<8x128xf32>
    %16 = tpu.matmul %14, %15, %cst_13 {dimension_numbers = #tpu.dot_dimension_numbers<[1], [0], [0], [1], [0, 0, 1, 1], [], []>} : vector<8x128xbf16>, vector<128x128xbf16>, vector<8x128xf32> -> vector<8x128xf32>
    %c0_14 = arith.constant 0 : index
    %c0_15 = arith.constant 0 : index
    %17 = vector.load %arg7[%c0_14, %c0_15] : memref<1x128xf32, #tpu.memory_space<vmem>>, vector<1x128xf32>
    %18 = vector.broadcast %17 : vector<1x128xf32> to vector<8x128xf32>
    %19 = arith.addf %16, %18 : vector<8x128xf32>
    %cst_16 = arith.constant 0.000000e+00 : f32
    %20 = vector.broadcast %cst_16 : f32 to vector<8x128xf32>
    %21 = arith.maximumf %19, %20 : vector<8x128xf32>
    %22 = arith.truncf %21 : vector<8x128xf32> to vector<8x128xbf16>
    %c0_17 = arith.constant 0 : index
    %c0_18 = arith.constant 0 : index
    %23 = vector.load %arg8[%c0_17, %c0_18] : memref<128x128xbf16, #tpu.memory_space<vmem>>, vector<128x128xbf16>
    %cst_19 = arith.constant dense<0.000000e+00> : vector<8x128xf32>
    %24 = tpu.matmul %22, %23, %cst_19 {dimension_numbers = #tpu.dot_dimension_numbers<[1], [0], [0], [1], [0, 0, 1, 1], [], []>} : vector<8x128xbf16>, vector<128x128xbf16>, vector<8x128xf32> -> vector<8x128xf32>
    %c0_20 = arith.constant 0 : index
    %c0_21 = arith.constant 0 : index
    %25 = vector.load %arg9[%c0_20, %c0_21] : memref<1x128xf32, #tpu.memory_space<vmem>>, vector<1x128xf32>
    %26 = vector.broadcast %25 : vector<1x128xf32> to vector<8x128xf32>
    %27 = arith.addf %24, %26 : vector<8x128xf32>
    %cst_22 = arith.constant 0.000000e+00 : f32
    %28 = vector.broadcast %cst_22 : f32 to vector<8x128xf32>
    %29 = arith.maximumf %27, %28 : vector<8x128xf32>
    %30 = arith.truncf %29 : vector<8x128xf32> to vector<8x128xbf16>
    %c0_23 = arith.constant 0 : index
    %c0_24 = arith.constant 0 : index
    %31 = vector.load %arg10[%c0_23, %c0_24] : memref<128x128xbf16, #tpu.memory_space<vmem>>, vector<128x128xbf16>
    %cst_25 = arith.constant dense<0.000000e+00> : vector<8x128xf32>
    %32 = tpu.matmul %30, %31, %cst_25 {dimension_numbers = #tpu.dot_dimension_numbers<[1], [0], [0], [1], [0, 0, 1, 1], [], []>} : vector<8x128xbf16>, vector<128x128xbf16>, vector<8x128xf32> -> vector<8x128xf32>
    %c0_26 = arith.constant 0 : index
    %c0_27 = arith.constant 0 : index
    %33 = vector.load %arg11[%c0_26, %c0_27] : memref<1x128xf32, #tpu.memory_space<vmem>>, vector<1x128xf32>
    %34 = vector.broadcast %33 : vector<1x128xf32> to vector<8x128xf32>
    %35 = arith.addf %32, %34 : vector<8x128xf32>
    %36 = vector.extract_strided_slice %35 {offsets = [0, 0], sizes = [8, 12], strides = [1, 1]} : vector<8x128xf32> to vector<8x12xf32>
    %37 = math.tanh %36 : vector<8x12xf32>
    %c0_28 = arith.constant 0 : index
    %c0_29 = arith.constant 0 : index
    %38 = vector.load %arg12[%c0_28, %c0_29] : memref<8x12xf32, #tpu.memory_space<vmem>>, vector<8x12xf32>
    tpu.vector_store %arg12[%c0_28, %c0_29], %37 {strides = array<i32>} : memref<8x12xf32, #tpu.memory_space<vmem>>, vector<8x12xf32>,
    return
  }
  func.func @transform_0(%arg0: i32) -> (i32, i32) {
    %c0_i32 = arith.constant 0 : i32
    %c0_i32_0 = arith.constant 0 : i32
    return %arg0, %c0_i32 : i32, i32
  }
  func.func @transform_1(%arg0: i32) -> (i32, i32) {
    %c0_i32 = arith.constant 0 : i32
    %c0_i32_0 = arith.constant 0 : i32
    return %arg0, %c0_i32 : i32, i32
  }
  func.func @transform_2(%arg0: i32) -> (i32, i32) {
    %c0_i32 = arith.constant 0 : i32
    %c0_i32_0 = arith.constant 0 : i32
    %c0_i32_1 = arith.constant 0 : i32
    return %c0_i32, %c0_i32_0 : i32, i32
  }
  func.func @transform_3(%arg0: i32) -> (i32, i32) {
    %c0_i32 = arith.constant 0 : i32
    %c0_i32_0 = arith.constant 0 : i32
    %c0_i32_1 = arith.constant 0 : i32
    return %c0_i32, %c0_i32_0 : i32, i32
  }
  func.func @transform_4(%arg0: i32) -> (i32, i32) {
    %c0_i32 = arith.constant 0 : i32
    %c0_i32_0 = arith.constant 0 : i32
    %c0_i32_1 = arith.constant 0 : i32
    return %c0_i32, %c0_i32_0 : i32, i32
  }
  func.func @transform_5(%arg0: i32) -> (i32, i32) {
    %c0_i32 = arith.constant 0 : i32
    %c0_i32_0 = arith.constant 0 : i32
    %c0_i32_1 = arith.constant 0 : i32
    return %c0_i32, %c0_i32_0 : i32, i32
  }
  func.func @transform_6(%arg0: i32) -> (i32, i32) {
    %c0_i32 = arith.constant 0 : i32
    %c0_i32_0 = arith.constant 0 : i32
    %c0_i32_1 = arith.constant 0 : i32
    return %c0_i32, %c0_i32_0 : i32, i32
  }
  func.func @transform_7(%arg0: i32) -> (i32, i32) {
    %c0_i32 = arith.constant 0 : i32
    %c0_i32_0 = arith.constant 0 : i32
    %c0_i32_1 = arith.constant 0 : i32
    return %c0_i32, %c0_i32_0 : i32, i32
  }
  func.func @transform_8(%arg0: i32) -> (i32, i32) {
    %c0_i32 = arith.constant 0 : i32
    %c0_i32_0 = arith.constant 0 : i32
    %c0_i32_1 = arith.constant 0 : i32
    return %c0_i32, %c0_i32_0 : i32, i32
  }
  func.func @transform_9(%arg0: i32) -> (i32, i32) {
    %c0_i32 = arith.constant 0 : i32
    %c0_i32_0 = arith.constant 0 : i32
    %c0_i32_1 = arith.constant 0 : i32
    return %c0_i32, %c0_i32_0 : i32, i32
  }
  func.func @transform_10(%arg0: i32) -> (i32, i32) {
    %c0_i32 = arith.constant 0 : i32
    %c0_i32_0 = arith.constant 0 : i32
    %c0_i32_1 = arith.constant 0 : i32
    return %c0_i32, %c0_i32_0 : i32, i32
  }
  func.func @transform_11(%arg0: i32) -> (i32, i32) {
    %c0_i32 = arith.constant 0 : i32
    %c0_i32_0 = arith.constant 0 : i32
    return %arg0, %c0_i32 : i32, i32
  }
}

</mosaic_0001>

<bundles_post_ra>
// kernel: persona_evolution_forward.1
= control target key start
LH: loop header
LB: loop body
LE: loop exit
PB: predicated region body
PF: predicated region fallthrough
CT: control target
= control target key end

     0   :  { %16 = vsyncpa [#allocation3], 0  ;;  %s1096_s0 = inlined_call_operand.hbm [shape: f32[8,12], index: 0, kind: input, shape index: {}]   ;;  %s1097_s1 = inlined_call_operand.hbm [shape: f32[8,6], index: 1, kind: input, shape index: {}]   ;;  %s1098_s2 = inlined_call_operand.vmem [shape: bf16[12,128], index: 2, kind: input, shape index: {}]   ;;  %s1099_s3 = inlined_call_operand.vmem [shape: bf16[6,128], index: 3, kind: input, shape index: {}]   ;;  %s1100_s4 = inlined_call_operand.vmem [shape: f32[1,128], index: 4, kind: input, shape index: {}]   ;;  %s1101_s5 = inlined_call_operand.hbm [shape: bf16[128,128], index: 5, kind: input, shape index: {}]   ;;  %s1102_s6 = inlined_call_operand.vmem [shape: f32[1,128], index: 6, kind: input, shape index: {}]   ;;  %s1103_s7 = inlined_call_operand.hbm [shape: bf16[128,128], index: 7, kind: input, shape index: {}]   ;;  %s1104_s8 = inlined_call_operand.vmem [shape: f32[1,128], index: 8, kind: input, shape index: {}]   ;;  %s1105_s9 = inlined_call_operand.hbm [shape: bf16[128,128], index: 9, kind: input, shape index: {}]   ;;  %s1106_s10 = inlined_call_operand.vmem [shape: f32[1,128], index: 10, kind: input, shape index: {}]   ;;  %s1107_s11 = inlined_call_operand.hbm [shape: f32[8,12], index: 11, kind: output, shape index: {}]  }
   0x1   :  { %17 = vsyncpa [#allocation6], 0 }
   0x2   :  { %18 = vsyncpa [#allocation9], 0 }
   0x3   :  { %19 = vsyncpa [#allocation4], 0  ;;  %s889_s17 = smov [#allocation5]   ;;  %s749_s21 = scalar_lea.hbm %s1097_s1, 128 }
   0x4   :  { %s36_s18 = sshll.u32 %s889_s17, 4  ;;  %p750_p0 = scmp.ne.s32.totalorder %s1097_s1, %s749_s21  ;;  %s37_s18 = int_to_ptr.vmem [resolvable:$true] %s36_s18 }
   0x5   :  { %p753_p1 = scmp.lt.u32.totalorder %s749_s21, %s1097_s1 }
   0x7   :  { %p755_p2 = pnand %p753_p1, %p750_p0 }
   0x9   :  { %758 = shalt.err (!%p755_p2)
}
   0xa   :  { %s759_s26 = scalar_lea.vmem %s37_s18, 128  ;;  %p764_p4 = scmp.lt.s32.totalorder %s37_s18, %s37_s18 }
   0xb   :  { %p760_p3 = scmp.ne.s32.totalorder %s37_s18, %s759_s26  ;;  %p765_p5 = scmp.lt.s32.totalorder %s759_s26, %s759_s26 }
   0xd   :  { %p766_p6 = por %p765_p5, %p764_p4 }
   0xf   :  { %p767_p7 = pnand %p766_p6, %p760_p3 }
  0x11   :  { %770 = shalt.err (!%p767_p7)
}
  0x12   :  { %39 = dma.hbm_to_vmem [thread:$0]  %s1097_s1, 128, %s37_s18, [#allocation6]  }
  0x13   :  { %s890_s29 = smov [#allocation8]   ;;  %s891_s12 = smov [#allocation2]  }
  0x14   :  { %s65_s30 = sshll.u32 %s890_s29, 4  ;;  %s26_s13 = sshll.u32 %s891_s12, 4  ;;  %s66_s30 = int_to_ptr.vmem [resolvable:$true] %s65_s30  ;;  %s27_s13 = int_to_ptr.vmem [resolvable:$true] %s26_s13 }
  0x15   :  { %s771_s16 = scalar_lea.hbm %s1103_s7, 1024 }
  0x16   :  { %p772_p8 = scmp.ne.s32.totalorder %s1103_s7, %s771_s16  ;;  %p775_p9 = scmp.lt.u32.totalorder %s771_s16, %s1103_s7 }
  0x18   :  { %p777_p10 = pnand %p775_p9, %p772_p8 }
  0x1a   :  { %780 = shalt.err (!%p777_p10)
}
  0x1b   :  { %s781_s1 = scalar_lea.vmem %s66_s30, 1024  ;;  %p786_p12 = scmp.lt.s32.totalorder %s66_s30, %s66_s30 }
  0x1c   :  { %p782_p11 = scmp.ne.s32.totalorder %s66_s30, %s781_s1  ;;  %p787_p13 = scmp.lt.s32.totalorder %s781_s1, %s781_s1 }
  0x1e   :  { %p788_p0 = por %p787_p13, %p786_p12 }
  0x20   :  { %p789_p1 = pnand %p788_p0, %p782_p11 }
  0x22   :  { %792 = shalt.err (!%p789_p1)
}
  0x23   :  { %s892_s18 = smov 64   ;;  %s893_s22 = smov 4  }
  0x24   :  { %71 = dma.hbm_to_vmem [thread:$0]  %s1103_s7, 1024, %s66_s30, [#allocation9], %s892_s18, %s892_s18, %s893_s22  }
  0x25   :  { %s793_s27 = scalar_lea.hbm %s1096_s0, 128 }
  0x26   :  { %p794_p2 = scmp.ne.s32.totalorder %s1096_s0, %s793_s27  ;;  %p797_p3 = scmp.lt.u32.totalorder %s793_s27, %s1096_s0 }
  0x28   :  { %p799_p4 = pnand %p797_p3, %p794_p2 }
  0x2a   :  { %802 = shalt.err (!%p799_p4)
}
  0x2b   :  { %s803_s15 = scalar_lea.vmem %s27_s13, 128  ;;  %p808_p6 = scmp.lt.s32.totalorder %s27_s13, %s27_s13 }
  0x2c   :  { %p804_p5 = scmp.ne.s32.totalorder %s27_s13, %s803_s15  ;;  %p809_p7 = scmp.lt.s32.totalorder %s803_s15, %s803_s15 }
  0x2e   :  { %p810_p8 = por %p809_p7, %p808_p6 }
  0x30   :  { %p811_p9 = pnand %p810_p8, %p804_p5 }
  0x32   :  { %814 = shalt.err (!%p811_p9)
}
  0x33   :  { %29 = dma.hbm_to_vmem [thread:$0]  %s1096_s0, 128, %s27_s13, [#allocation3]  }
  0x34   :  { %s894_s16 = smov [#allocation7]   ;;  %s895_s19 = smov [#allocation10]  }
  0x35   :  { %s51_s17 = sshll.u32 %s894_s16, 4  ;;  %s79_s20 = sshll.u32 %s895_s19, 4  ;;  %s52_s17 = int_to_ptr.vmem [resolvable:$true] %s51_s17  ;;  %s80_s20 = int_to_ptr.vmem [resolvable:$true] %s79_s20 }
  0x36   :  { %s815_s23 = scalar_lea.hbm %s1101_s5, 1024 }
  0x37   :  { %p816_p10 = scmp.ne.s32.totalorder %s1101_s5, %s815_s23  ;;  %p819_p11 = scmp.lt.u32.totalorder %s815_s23, %s1101_s5 }
  0x39   :  { %p821_p12 = pnand %p819_p11, %p816_p10 }
  0x3b   :  { %824 = shalt.err (!%p821_p12)
}
  0x3c   :  { %s825_s0 = scalar_lea.vmem %s52_s17, 1024  ;;  %p830_p0 = scmp.lt.s32.totalorder %s52_s17, %s52_s17 }
  0x3d   :  { %p826_p13 = scmp.ne.s32.totalorder %s52_s17, %s825_s0  ;;  %p831_p1 = scmp.lt.s32.totalorder %s825_s0, %s825_s0 }
  0x3f   :  { %p832_p2 = por %p831_p1, %p830_p0 }
  0x41   :  { %p833_p3 = pnand %p832_p2, %p826_p13 }
  0x43   :  { %836 = shalt.err (!%p833_p3)
}
  0x44   :  { %57 = dma.hbm_to_vmem [thread:$0]  %s1101_s5, 1024, %s52_s17, [#allocation6], %s892_s18, %s892_s18, %s893_s22  }
  0x45   :  { %s837_s14 = scalar_lea.hbm %s1105_s9, 1024 }
  0x46   :  { %p838_p4 = scmp.ne.s32.totalorder %s1105_s9, %s837_s14  ;;  %p841_p5 = scmp.lt.u32.totalorder %s837_s14, %s1105_s9 }
  0x48   :  { %p843_p6 = pnand %p841_p5, %p838_p4 }
  0x4a   :  { %846 = shalt.err (!%p843_p6)
}
  0x4b   :  { %s847_s19 = scalar_lea.vmem %s80_s20, 1024  ;;  %p852_p8 = scmp.lt.s32.totalorder %s80_s20, %s80_s20 }
  0x4c   :  { %p848_p7 = scmp.ne.s32.totalorder %s80_s20, %s847_s19  ;;  %p853_p9 = scmp.lt.s32.totalorder %s847_s19, %s847_s19 }
  0x4e   :  { %p854_p10 = por %p853_p9, %p852_p8 }
  0x50   :  { %p855_p11 = pnand %p854_p10, %p848_p7 }
  0x52   :  { %858 = shalt.err (!%p855_p11)
}
  0x53   :  { %85 = dma.hbm_to_vmem [thread:$0]  %s1105_s9, 1024, %s80_s20, [#allocation9], %s892_s18, %s892_s18, %s893_s22  }
  0x54   :  { %881 = dma.done.wait [#allocation3], 128  }
  0x55   :  { %882 = vsyncadd [#allocation3], 4294967168 }
  0x56   :  { %883 = dma.done.wait [#allocation6], 1152  }
  0x57   :  { %884 = vsyncadd [#allocation6], 4294966144 }
  0x58   :  { %885 = dma.done.wait [#allocation9], 2048  }
  0x59   :  { %886 = vsyncadd [#allocation9], 4294965248  ;;  %v896_v0 = vmov 0.0   ;;  %vm897_vm0 = vmmov 0   ;;  %vm115_vm1 = vcmask 1042432   ;;  %v108_v2 = vld [vmem:[#allocation5] sm:$0xff] }
  0x5a   :  { %640 = vmatprep.subr.bf16.mxu1 %v896_v0  ;;  %642 = vmatprep.mubr.msk.bf16.mxu1 %vm897_vm0, %v896_v0  ;;  %v110_v1 = vld [vmem:[%s1099_s3] sm:$0x7]  ;;  %vm168_vm2 = vcmask 1045504   ;;  %v109_v4 = vpack.c.bf16 %v108_v2, %v108_v2  ;;  %vm111_vm3 = vcmask 48128   ;;  %v723_v6 = vld [vmem:[#allocation7] sm:$0xff]   ;;  %v724_v8 = vld [vmem:[#allocation7 + $0x8] sm:$0xff]  }
  0x5b   :  { %652 = vmatprep.subr.bf16.mxu0 %v896_v0  ;;  %668 = vmatprep.mubr.msk.bf16.mxu0 %vm897_vm0, %v896_v0  ;;  %v117_v3 = vsel %vm115_vm1, %v110_v1, 0  ;;  %v722_v5 = vld [vmem:[%s1098_s2] sm:$0x3f]   ;;  %vm164_vm4 = vcmask 97280   ;;  %v726_v12 = vld [vmem:[#allocation7 + $0x18] sm:$0xff]   ;;  %v727_v13 = vld [vmem:[#allocation7 + $0x20] sm:$0xff]  }
  0x5c   :  { %641 = vmatpush3.bf16.msra.mxu1 %v117_v3  ;;  %v170_v7 = vsel %vm168_vm2, %v722_v5, 0  ;;  %653 = vmatpush3.bf16.msra.mxu0 %v723_v6  ;;  %v104_v9 = vld [vmem:[#allocation2] sm:$0xff]  ;;  %v728_v14 = vld [vmem:[#allocation7 + $0x28] sm:$0xff]   ;;  %v730_v16 = vld [vmem:[#allocation7 + $0x38] sm:$0xff]   ;;  %s898_s25 = smov [#allocation11]  }
  0x5d   :  { %646 = vmatprep.subr.bf16.mxu1 %v896_v0  ;;  %654 = vmatprep.subr.bf16.mxu0 %v896_v0  ;;  %v725_v10 = vld [vmem:[#allocation7 + $0x10] sm:$0xff]   ;;  %v105_v11 = vpack.c.bf16 %v104_v9, %v104_v9  ;;  %v731_v17 = vld [vmem:[#allocation8] sm:$0xff]   ;;  %v732_v18 = vld [vmem:[#allocation8 + $0x8] sm:$0xff]  }
  0x5e   :  { %v729_v15 = vld [vmem:[#allocation7 + $0x30] sm:$0xff]   ;;  %v734_v20 = vld [vmem:[#allocation8 + $0x18] sm:$0xff]   ;;  %v735_v21 = vld [vmem:[#allocation8 + $0x20] sm:$0xff]  }
  0x5f   :  { %643 = vmatmul.mubr.msk.bf16.vlgmr.msra.gmra.mrb[0].mxu1 %vm111_vm3, %v109_v4  ;;  %v733_v19 = vld [vmem:[#allocation8 + $0x10] sm:$0xff]   ;;  %v736_v22 = vld [vmem:[#allocation8 + $0x28] sm:$0xff]   ;;  %v738_v37 = vld [vmem:[#allocation8 + $0x38] sm:$0xff]  }
  0x60   :  { %647 = vmatpush3.bf16.msra.mxu1 %v170_v7  ;;  %648 = vmatprep.mubr.msk.bf16.mxu1 %vm897_vm0, %v896_v0  ;;  %v581_v28 = vld [vmem:[%s1100_s4] ss:$0 sm:$0xff]  ;;  %v739_v38 = vld [vmem:[#allocation10] sm:$0xff]   ;;  %v740_v39 = vld [vmem:[#allocation10 + $0x8] sm:$0xff]  }
  0x61   :  { %672 = vmatprep.subr.bf16.mxu1 %v896_v0  ;;  %655 = vmatpush3.bf16.msra.mxu0 %v724_v8  ;;  %v737_v36 = vld [vmem:[#allocation8 + $0x30] sm:$0xff]   ;;  %v742_v41 = vld [vmem:[#allocation10 + $0x18] sm:$0xff]   ;;  %v743_v42 = vld [vmem:[#allocation10 + $0x20] sm:$0xff]  }
  0x62   :  { %656 = vmatprep.subr.bf16.mxu0 %v896_v0  ;;  %v741_v40 = vld [vmem:[#allocation10 + $0x10] sm:$0xff]   ;;  %v744_v43 = vld [vmem:[#allocation10 + $0x28] sm:$0xff]   ;;  %v746_v53 = vld [vmem:[#allocation10 + $0x38] sm:$0xff]  }
  0x63   :  { %v582_v44 = vld [vmem:[%s1102_s6] ss:$0 sm:$0xff] }
  0x64   :  { %v745_v52 = vld [vmem:[#allocation10 + $0x30] sm:$0xff]  }
  0x65   :  { %657 = vmatpush3.bf16.msra.mxu0 %v725_v10  ;;  %v591_v54 = vld [vmem:[%s1104_s8] ss:$0 sm:$0xff]  ;;  %s567_s8 = sshll.u32 %s898_s25, 4  ;;  %s568_s8 = int_to_ptr.vmem [resolvable:$true] %s567_s8 }
  0x66   :  { %658 = vmatprep.subr.bf16.mxu0 %v896_v0  ;;  %v600_v62 = vld [vmem:[%s1106_s10] ss:$0 sm:$0xff]  ;;  %s859_s26 = scalar_lea.vmem %s568_s8, 128  ;;  %p864_p13 = scmp.lt.s32.totalorder %s568_s8, %s568_s8 }
  0x67   :  { %649 = vmatmul.mubr.msk.bf16.vlgmr.msra.gmra.mrb[4].mxu1 %vm164_vm4, %v105_v11  ;;  %p860_p12 = scmp.ne.s32.totalorder %s568_s8, %s859_s26  ;;  %p865_p0 = scmp.lt.s32.totalorder %s859_s26, %s859_s26 }
  0x68   :  { %688 = vmatprep.mubr.msk.bf16.mxu1 %vm897_vm0, %v896_v0  ;;  %673 = vmatpush3.bf16.msra.mxu1 %v731_v17 }
  0x69   :  { %659 = vmatpush3.bf16.msra.mxu0 %v726_v12  ;;  %674 = vmatprep.subr.bf16.mxu1 %v896_v0  ;;  %p866_p1 = por %p865_p0, %p864_p13 }
  0x6a   :  { %660 = vmatprep.subr.bf16.mxu0 %v896_v0 }
  0x6b   :  { %p867_p2 = pnand %p866_p1, %p860_p12 }
  0x6c   :  { %675 = vmatpush3.bf16.msra.mxu1 %v732_v18 }
  0x6d   :  { %661 = vmatpush3.bf16.msra.mxu0 %v727_v13  ;;  %676 = vmatprep.subr.bf16.mxu1 %v896_v0 }
  0x6e   :  { %662 = vmatprep.subr.bf16.mxu0 %v896_v0 }
  0x70   :  { %677 = vmatpush3.bf16.msra.mxu1 %v733_v19 }
  0x71   :  { %663 = vmatpush3.bf16.msra.mxu0 %v728_v14  ;;  %678 = vmatprep.subr.bf16.mxu1 %v896_v0 }
  0x72   :  { %664 = vmatprep.subr.bf16.mxu0 %v896_v0 }
  0x74   :  { %679 = vmatpush3.bf16.msra.mxu1 %v734_v20 }
  0x75   :  { %665 = vmatpush3.bf16.msra.mxu0 %v729_v15  ;;  %680 = vmatprep.subr.bf16.mxu1 %v896_v0 }
  0x76   :  { %666 = vmatprep.subr.bf16.mxu0 %v896_v0 }
  0x78   :  { %681 = vmatpush3.bf16.msra.mxu1 %v735_v21 }
  0x79   :  { %667 = vmatpush3.bf16.msra.mxu0 %v730_v16  ;;  %682 = vmatprep.subr.bf16.mxu1 %v896_v0 }
  0x7a   :  { %692 = vmatprep.subr.bf16.mxu0 %v896_v0 }
  0x7c   :  { %683 = vmatpush3.bf16.msra.mxu1 %v736_v22 }
  0x7d   :  { %684 = vmatprep.subr.bf16.mxu1 %v896_v0 }
  0x80   :  { %685 = vmatpush3.bf16.msra.mxu1 %v737_v36 }
  0x81   :  { %686 = vmatprep.subr.bf16.mxu1 %v896_v0 }
  0x84   :  { %687 = vmatpush3.bf16.msra.mxu1 %v738_v37 }
 0x132   :  { %v153_v23 = vpop.f32.mrb[0].mxu1 }
 0x133   :  { %v644_v24 = vpop.f32.mrb[1].mxu1 }
 0x134   :  { %v156_v25 = vpop.f32.mrb[2].mxu1 }
 0x135   :  { %v645_v26 = vpop.f32.mrb[3].mxu1 }
 0x13a   :  { %v206_v27 = vpop.f32.mrb[4].mxu1 }
 0x13b   :  { %v207_v29 = vadd.f32 %v206_v27, %v153_v23  ;;  %v650_v30 = vpop.f32.mrb[5].mxu1 }
 0x13c   :  { %v209_v31 = vpop.f32.mrb[6].mxu1 }
 0x13d   :  { %v219_v32 = vadd.f32 %v581_v28, %v207_v29  ;;  %v651_v33 = vpop.f32.mrb[7].mxu1 }
 0x13f   :  { %v220_v34 = vmax.f32 %v219_v32, 0.0 }
 0x141   :  { %v221_v35 = vpack.c.bf16 %v220_v34, %v220_v34 }
 0x143   :  { %669 = vmatmul.mubr.bf16.vlgmr.msra.gmra.mrb[0].mxu0 %v221_v35 }
 0x144   :  { %708 = vmatprep.mubr.msk.bf16.mxu0 %vm897_vm0, %v896_v0  ;;  %693 = vmatpush3.bf16.msra.mxu0 %v739_v38 }
 0x145   :  { %694 = vmatprep.subr.bf16.mxu0 %v896_v0 }
 0x148   :  { %695 = vmatpush3.bf16.msra.mxu0 %v740_v39 }
 0x149   :  { %696 = vmatprep.subr.bf16.mxu0 %v896_v0 }
 0x14c   :  { %697 = vmatpush3.bf16.msra.mxu0 %v741_v40 }
 0x14d   :  { %698 = vmatprep.subr.bf16.mxu0 %v896_v0 }
 0x150   :  { %699 = vmatpush3.bf16.msra.mxu0 %v742_v41 }
 0x151   :  { %700 = vmatprep.subr.bf16.mxu0 %v896_v0 }
 0x154   :  { %701 = vmatpush3.bf16.msra.mxu0 %v743_v42 }
 0x155   :  { %702 = vmatprep.subr.bf16.mxu0 %v896_v0 }
 0x158   :  { %703 = vmatpush3.bf16.msra.mxu0 %v744_v43 }
 0x159   :  { %704 = vmatprep.subr.bf16.mxu0 %v896_v0 }
 0x15c   :  { %705 = vmatpush3.bf16.msra.mxu0 %v745_v52 }
 0x15d   :  { %706 = vmatprep.subr.bf16.mxu0 %v896_v0 }
 0x160   :  { %707 = vmatpush3.bf16.msra.mxu0 %v746_v53 }
 0x216   :  { %v327_v45 = vpop.f32.mrb[0].mxu0 }
 0x217   :  { %v328_v46 = vadd.f32 %v582_v44, %v327_v45  ;;  %v670_v47 = vpop.f32.mrb[1].mxu0 }
 0x218   :  { %v330_v48 = vpop.f32.mrb[2].mxu0 }
 0x219   :  { %v333_v49 = vmax.f32 %v328_v46, 0.0  ;;  %v671_v50 = vpop.f32.mrb[3].mxu0 }
 0x21b   :  { %v334_v51 = vpack.c.bf16 %v333_v49, %v333_v49 }
 0x21d   :  { %689 = vmatmul.mubr.bf16.vlgmr.msra.gmra.mrb[8].mxu1 %v334_v51 }
 0x2f0   :  { %v440_v55 = vpop.f32.mrb[8].mxu1 }
 0x2f1   :  { %v441_v56 = vadd.f32 %v591_v54, %v440_v55  ;;  %v690_v57 = vpop.f32.mrb[9].mxu1 }
 0x2f2   :  { %v443_v58 = vpop.f32.mrb[10].mxu1 }
 0x2f3   :  { %v446_v59 = vmax.f32 %v441_v56, 0.0  ;;  %v691_v60 = vpop.f32.mrb[11].mxu1 }
 0x2f5   :  { %v447_v61 = vpack.c.bf16 %v446_v59, %v446_v59 }
 0x2f7   :  { %709 = vmatmul.mubr.bf16.vlgmr.msra.gmra.mrb[4].mxu0 %v447_v61 }
 0x3ca   :  { %v553_v63 = vpop.f32.mrb[4].mxu0 }
 0x3cb   :  { %v554_v0 = vadd.f32 %v600_v62, %v553_v63  ;;  %v710_v1 = vpop.f32.mrb[5].mxu0 }
 0x3cc   :  { %v556_v2 = vpop.f32.mrb[6].mxu0 }
 0x3cd   :  { %747 = vtanh.f32 %v554_v0  ;;  %v711_v3 = vpop.f32.mrb[7].mxu0 }
 0x3d7   :  { %v748_v4 = vpop.eup %747 }
 0x3d8   :  { %560 = vst.msk [vmem:[#allocation11] sm:$0xff] %vm164_vm4, %v748_v4 }
 0x3d9   :  { %870 = shalt.err (!%p867_p2)
}
 0x3da   :  { %s871_s0 = scalar_lea.hbm %s1107_s11, 128 }
 0x3db   :  { %p872_p3 = scmp.ne.s32.totalorder %s1107_s11, %s871_s0  ;;  %p875_p4 = scmp.lt.u32.totalorder %s871_s0, %s1107_s11 }
 0x3dd   :  { %p877_p5 = pnand %p875_p4, %p872_p3 }
 0x3df   :  { %880 = shalt.err (!%p877_p5)
}
 0x3e0   :  { %570 = dma.vmem_to_hbm [thread:$0]  %s568_s8, 128, %s1107_s11, [#allocation4]  }
 0x3e1   :  { %887 = dma.done.wait [#allocation4], 128  }
 0x3e2   :  { %888 = vsyncadd [#allocation4], 4294967168 }
 0x3e3   :  { %574 = vsyncpa [#allocation3], 1 }
 0x3e4   :  { %575 = vsyncpa [#allocation6], 1 }
 0x3e5   :  { %576 = vsyncpa [#allocation9], 1 }
 0x3e6   :  { %577 = vsyncpa [#allocation4], 1 }

</bundles_post_ra>
